<compile_context>
chip_gen: v6e
topology: v6e:2x2x1
jax: 0.10.0
libtpu: 0.0.40
codegen_flags: <defaults>
</compile_context>

<pallas_src>
import functools

import jax
import jax.numpy as jnp
from jax.experimental import pallas as pl
from jax.experimental.pallas import tpu as pltpu

LN_EPS = 1e-12  # HF ViT layer_norm_eps


# ---------------------------------------------------------------------------
# Small matmul + bias kernel (patch embedding, classifier head).
# ---------------------------------------------------------------------------
def _matmul_bias_kernel(x_ref, w_ref, b_ref, o_ref):
    o_ref[...] = (
        jnp.dot(x_ref[...], w_ref[...], preferred_element_type=jnp.float32)
        + b_ref[...]
    )


def matmul_bias(x, w, b):
    """x: (M, K) f32, w: (K, N) f32, b: (1, N) f32 -> (M, N) f32.

    bf16 operands / fp32 accumulation; M padded to 8 sublanes, N padded to 128
    lanes so the store path is lane-dense (no masked partial stores)."""
    M, _ = x.shape
    N = w.shape[1]
    Mp = -(-M // 8) * 8
    Np = -(-N // 128) * 128
    xp = jnp.pad(x, ((0, Mp - M), (0, 0))).astype(jnp.bfloat16)
    wp = jnp.pad(w, ((0, 0), (0, Np - N))).astype(jnp.bfloat16)
    bp = jnp.pad(b, ((0, 0), (0, Np - N))).astype(jnp.float32)
    out = pl.pallas_call(
        _matmul_bias_kernel,
        out_shape=jax.ShapeDtypeStruct((Mp, Np), jnp.float32),
    )(xp, wp, bp)
    return out[:M, :N]


# ---------------------------------------------------------------------------
# VMEM sizing helpers.
# ---------------------------------------------------------------------------
def _vmem_limit_bytes():
    """Physical-VMEM-aware scoped limit with ~15% headroom for Mosaic scratch."""
    try:
        cap = int(pltpu.get_tpu_info().vmem_capacity_bytes)
        return max(32 << 20, min(int(cap * 0.85), 112 << 20))
    except Exception:
        return 64 << 20  # conservative, previously-validated default


def _pick_batch_block(B, Sp, H, inter, heads, vmem_budget):
    """Largest divisor of B whose per-layer-step working set fits the budget."""
    layer_w = 2 * (H * 3 * H + H * H + 2 * H * inter)            # bf16 weights/layer
    per_seq = 4 * (Sp * 3 * H + heads * Sp * Sp + 3 * Sp * H)    # fp32 temporaries
    per_seq += 2 * Sp * inter                                    # bf16 MLP interm.
    avail = vmem_budget - 2 * layer_w                            # double-buffered W
    cap = max(1, int(avail // max(per_seq, 1)))
    bb = int(max(1, min(B, cap)))
    while B % bb:
        bb -= 1
    return bb


def _pack_offsets(hidden, inter):
    """Lane offsets (128-aligned) for the packed per-layer LN/bias params."""
    segs = (("ln1_g", hidden), ("ln1_b", hidden), ("ln2_g", hidden),
            ("ln2_b", hidden), ("bo", hidden), ("b2", hidden),
            ("bqkv", 3 * hidden), ("b1", inter))
    offs, cur = {}, 0
    for name, n in segs:
        offs[name] = cur
        cur += -(-n // 128) * 128
    return offs, cur


# ---------------------------------------------------------------------------
# Fused encoder stack kernel: grid = (B // Bb, num_layers).
#   - fp32 residual carry lives in a VMEM scratch across the layer axis
#   - per-layer weights selected by the layer grid index and streamed
#     (double-buffered) through VMEM, amortized over Bb sequences.
# ---------------------------------------------------------------------------
def _layer_norm(x, gamma, beta):
    mu = jnp.mean(x, axis=-1, keepdims=True)
    var = jnp.mean(jnp.square(x - mu), axis=-1, keepdims=True)
    return (x - mu) * jax.lax.rsqrt(var + LN_EPS) * gamma + beta


def _encoder_stack_kernel(
    s_valid, num_heads, offs,
    x_ref, pk_ref, wqkv_ref, wo_ref, w1_ref, w2_ref,
    o_ref, res_ref,
):
    layer = pl.program_id(1)
    bb, sp, hidden = res_ref.shape
    inter_dim = w1_ref.shape[2]
    dh = hidden // num_heads
    m = bb * sp

    # Layer 0 of each batch block: load embeddings into the fp32 resident carry.
    @pl.when(layer == 0)
    def _():
        res_ref[...] = x_ref[...]

    def seg(name, n):  # tiny fp32 params, lane-packed at 128-aligned offsets
        o = offs[name]
        return pk_ref[0, :, o:o + n]                   # (1, n)

    x = res_ref[...].reshape(m, hidden)                # (Bb*Sp, H) fp32

    # ---- attention block: layernorm_before -> fused QKV -> MHA -> out proj ----
    xn = _layer_norm(x, seg("ln1_g", hidden), seg("ln1_b", hidden))
    # One (Bb*Sp, H) x (H, 3H) MXU matmul; 1/sqrt(dh) is folded into the Q
    # slice of wqkv (a real checkpoint's Q bias would need the same scaling).
    qkv = (
        jnp.dot(xn.astype(jnp.bfloat16), wqkv_ref[0],
                preferred_element_type=jnp.float32)
        + seg("bqkv", 3 * hidden)
    )                                                  # (m, 3H) fp32
    q2 = qkv[:, 0 * hidden:1 * hidden].astype(jnp.bfloat16)
    k2 = qkv[:, 1 * hidden:2 * hidden].astype(jnp.bfloat16)
    v2 = qkv[:, 2 * hidden:3 * hidden].astype(jnp.bfloat16)

    neg = None
    if s_valid < sp:                                   # static: mask padded keys
        col = jax.lax.broadcasted_iota(jnp.int32, (1, 1, sp), 2)
        neg = jnp.where(col < s_valid, jnp.float32(0.0), jnp.float32(-1e30))

    # Scores / softmax / context per batch element with a leading-head batched
    # einsum (proven Mosaic lowering).  Merging (Bb, nh) into one rank-4
    # batched dot would avoid this small static unroll but relies on
    # multi-batch-dim dot_general support; attention is ~5% of FLOPs here.
    ctx_rows = []
    for i in range(bb):
        r0 = i * sp
        qi = q2[r0:r0 + sp].reshape(sp, num_heads, dh).swapaxes(0, 1)  # (nh,Sp,dh)
        ki = k2[r0:r0 + sp].reshape(sp, num_heads, dh).swapaxes(0, 1)
        vi = v2[r0:r0 + sp].reshape(sp, num_heads, dh).swapaxes(0, 1)
        s = jnp.einsum("hqd,hkd->hqk", qi, ki,
                       preferred_element_type=jnp.float32)             # (nh,Sp,Sp)
        if neg is not None:
            s = s + neg
        mx = jnp.max(s, axis=-1, keepdims=True)
        p = jnp.exp(s - mx)
        p = p * pl.reciprocal(jnp.sum(p, axis=-1, keepdims=True), approx=True)
        ci = jnp.einsum("hqk,hkd->hqd", p.astype(jnp.bfloat16), vi,
                        preferred_element_type=jnp.float32)            # (nh,Sp,dh)
        ctx_rows.append(ci.swapaxes(0, 1).reshape(sp, hidden))
    ctx2d = jnp.concatenate(ctx_rows, axis=0).astype(jnp.bfloat16)      # (m, H)

    attn = (
        jnp.dot(ctx2d, wo_ref[0], preferred_element_type=jnp.float32)
        + seg("bo", hidden)
    )
    h1 = x + attn                                      # residual (fp32)

    # ---- MLP block: layernorm_after -> dense -> GELU -> dense -> residual ----
    h1n = _layer_norm(h1, seg("ln2_g", hidden), seg("ln2_b", hidden))
    # TODO(synk): HF ViT default is exact (erf) GELU; tanh approximation used
    # for robust Mosaic lowering (small numeric divergence).
    inter = jax.nn.gelu(
        jnp.dot(h1n.astype(jnp.bfloat16), w1_ref[0],
                preferred_element_type=jnp.float32) + seg("b1", inter_dim),
        approximate=True,
    ).astype(jnp.bfloat16)                             # largest temporary kept bf16
    out = h1 + (
        jnp.dot(inter, w2_ref[0], preferred_element_type=jnp.float32)
        + seg("b2", hidden)
    )

    out3 = out.reshape(bb, sp, hidden)
    res_ref[...] = out3                                # fp32 carry to next layer

    @pl.when(layer == pl.num_programs(1) - 1)
    def _():
        o_ref[...] = out3.astype(o_ref.dtype)          # single HBM store / block


def encoder_stack(x, stack, num_heads, s_valid):
    """x: (B, Sp, H) fp32; stack: packed small params + stacked bf16 weights."""
    B, Sp, H = x.shape
    L, _, inter = stack["w1"].shape
    offs = stack["pack_offsets"]

    vmem_budget = _vmem_limit_bytes()
    Bb = _pick_batch_block(B, Sp, H, inter, num_heads, vmem_budget)
    nb = B // Bb

    def wspec(arr):
        # One layer's slice, full in trailing dims, selected by the layer index.
        # (For a v6e-only build there is headroom for pipeline_mode=pl.Buffered(3)
        #  on wqkv/w1/w2; kept at default double-buffering for portability.)
        return pl.BlockSpec((1,) + arr.shape[1:], lambda b, l: (l, 0, 0))

    kernel = functools.partial(
        _encoder_stack_kernel, int(s_valid), int(num_heads), offs)

    return pl.pallas_call(
        kernel,
        grid=(nb, L),
        in_specs=[
            pl.BlockSpec((Bb, Sp, H), lambda b, l: (b, 0, 0)),   # embeddings
            wspec(stack["packed"]),                              # LN + biases
            wspec(stack["wqkv"]), wspec(stack["wo"]),
            wspec(stack["w1"]), wspec(stack["w2"]),
        ],
        out_specs=pl.BlockSpec((Bb, Sp, H), lambda b, l: (b, 0, 0)),
        out_shape=jax.ShapeDtypeStruct((B, Sp, H), jnp.float32),
        scratch_shapes=[pltpu.VMEM((Bb, Sp, H), jnp.float32)],   # fp32 residual carry
        compiler_params=pltpu.CompilerParams(
            # Batch-block axis is independent -> parallel (megacore) when there
            # is more than one block; layer axis carries the resident
            # activation -> arbitrary.
            dimension_semantics=(
                "parallel" if nb > 1 else "arbitrary", "arbitrary"),
            vmem_limit_bytes=vmem_budget,
        ),
    )(x, stack["packed"], stack["wqkv"], stack["wo"], stack["w1"], stack["w2"])


# ---------------------------------------------------------------------------
# Parameter init (deterministic, synthetic) and full forward.
# ---------------------------------------------------------------------------
def init_params(key, *, channels, patch, hidden, heads, layers, inter,
                num_patches, num_labels, total_prompts):
    dh = hidden // heads
    keys = iter(jax.random.split(key, 6 * layers + 8))

    def nrm(shape, scale=0.02):
        return (scale * jax.random.normal(next(keys), shape)).astype(jnp.float32)

    attn_scale = 1.0 / float(dh) ** 0.5
    offs, wpk = _pack_offsets(hidden, inter)

    wqkv, wo, w1, w2, packed = [], [], [], [], []
    for _ in range(layers):
        wq = nrm((hidden, hidden)) * attn_scale   # fold 1/sqrt(dh) into Q proj
        wk = nrm((hidden, hidden))
        wv = nrm((hidden, hidden))
        wqkv.append(jnp.concatenate([wq, wk, wv], axis=1))
        wo.append(nrm((hidden, hidden)))
        w1.append(nrm((hidden, inter)))
        w2.append(nrm((inter, hidden)))

        # Packed LN gammas/betas + all biases.  Biases / betas are zero-init
        # (a non-zero Q bias would also need the attn_scale folding above).
        pk = jnp.zeros((wpk,), jnp.float32)
        pk = pk.at[offs["ln1_g"]:offs["ln1_g"] + hidden].set(1.0)
        pk = pk.at[offs["ln2_g"]:offs["ln2_g"] + hidden].set(1.0)
        packed.append(pk)

    stack = {
        "packed": jnp.stack(packed)[:, None, :],        # (L, 1, Wpk) fp32
        "wqkv": jnp.stack(wqkv).astype(jnp.bfloat16),   # (L, H, 3H)
        "wo": jnp.stack(wo).astype(jnp.bfloat16),       # (L, H, H)
        "w1": jnp.stack(w1).astype(jnp.bfloat16),       # (L, H, I)
        "w2": jnp.stack(w2).astype(jnp.bfloat16),       # (L, I, H)
        "pack_offsets": offs,                           # static python ints
    }

    return {
        "patch_size": patch,
        "num_heads": heads,
        "patch_w": nrm((channels * patch * patch, hidden)),
        "patch_b": jnp.zeros((1, hidden), jnp.float32),
        "cls": nrm((1, 1, hidden)),
        "pos": nrm((1, 1 + num_patches, hidden)),
        # prompts ~ torch.randn (std 1)
        "prompts": jax.random.normal(
            next(keys), (total_prompts, hidden)).astype(jnp.float32),
        "cls_w": nrm((hidden, num_labels)),
        "cls_b": jnp.zeros((1, num_labels), jnp.float32),
        "stack": stack,
    }


def vit_prompt_forward(pixel_values, params):
    B, C, Himg, Wimg = pixel_values.shape
    P = params["patch_size"]
    Hn, Wn = Himg // P, Wimg // P
    hidden = params["cls"].shape[-1]

    # Patch-embedding conv (kernel==stride) == unfold + matmul (matmul in Pallas).
    patches = (
        pixel_values.reshape(B, C, Hn, P, Wn, P)
        .transpose(0, 2, 4, 1, 3, 5)                 # (B, Hn, Wn, C, P, P)
        .reshape(B * Hn * Wn, C * P * P)
    )
    patch_emb = matmul_bias(patches, params["patch_w"], params["patch_b"])
    patch_emb = patch_emb.reshape(B, Hn * Wn, hidden)

    cls = jnp.broadcast_to(params["cls"], (B, 1, hidden))
    emb = jnp.concatenate([cls, patch_emb], axis=1) + params["pos"]
    # TODO(synk): embedding/encoder dropout treated as identity (eval mode).

    prompts = jnp.broadcast_to(
        params["prompts"][None], (B,) + params["prompts"].shape)
    x = jnp.concatenate([emb[:, :1], prompts, emb[:, 1:]], axis=1)  # (B, S, H)

    S = x.shape[1]
    Sp = max(8, -(-S // 8) * 8)                      # pad seq to sublane multiple
    if Sp != S:
        x = jnp.pad(x, ((0, 0), (0, Sp - S), (0, 0)))

    x = encoder_stack(x.astype(jnp.float32), params["stack"],
                      params["num_heads"], s_valid=S)

    # Matches the PyTorch module exactly — no final encoder LayerNorm,
    # classifier reads the CLS token (row 0, always a real token) of the
    # raw encoder output.
    logits = matmul_bias(x[:, 0], params["cls_w"], params["cls_b"])
    return logits


if __name__ == "__main__":
    # Smoke-test shapes only: H=32 / Sp=16 leave every matmul lane-sparse; the
    # tiling decisions above pay off at ViT-Base-class dims (H, 3H multiples of
    # 128, ~14 MB bf16 weights per layer).
    B, C, IMG, P = 2, 3, 16, 8           # 4 patches
    HIDDEN, HEADS, LAYERS, INTER = 32, 4, 2, 128
    NUM_LABELS, TOTAL_PROMPTS = 5, 4     # per-client prompt split unused in fwd
    NUM_PATCHES = (IMG // P) * (IMG // P)

    key = jax.random.PRNGKey(0)
    k_params, k_x = jax.random.split(key)
    params = init_params(
        k_params, channels=C, patch=P, hidden=HIDDEN, heads=HEADS,
        layers=LAYERS, inter=INTER, num_patches=NUM_PATCHES,
        num_labels=NUM_LABELS, total_prompts=TOTAL_PROMPTS,
    )
    pixel_values = jax.random.normal(k_x, (B, C, IMG, IMG), dtype=jnp.float32)

    logits = vit_prompt_forward(pixel_values, params)
    jax.block_until_ready(logits)
    assert logits.shape == (B, NUM_LABELS)
    print("KERNEL_OK")
</pallas_src>

<mosaic_0001>
module attributes {stable_mosaic.version = 11 : i64} {
  func.func @_matmul_bias_kernel(%arg0: memref<8x192xbf16, #tpu.memory_space<vmem>>, %arg1: memref<192x128xbf16, #tpu.memory_space<vmem>>, %arg2: memref<1x128xf32, #tpu.memory_space<vmem>>, %arg3: memref<8x128xf32, #tpu.memory_space<vmem>>) attributes {dimension_semantics = [], scalar_prefetch = 0 : i64, scratch_operands = 0 : i64, tpu.core_type = #tpu.core_type<tc>} {
    %c0 = arith.constant 0 : index
    %c0_0 = arith.constant 0 : index
    %0 = vector.load %arg0[%c0, %c0_0] : memref<8x192xbf16, #tpu.memory_space<vmem>>, vector<8x192xbf16>
    %c0_1 = arith.constant 0 : index
    %c0_2 = arith.constant 0 : index
    %1 = vector.load %arg1[%c0_1, %c0_2] : memref<192x128xbf16, #tpu.memory_space<vmem>>, vector<192x128xbf16>
    %cst = arith.constant dense<0.000000e+00> : vector<8x128xf32>
    %2 = tpu.matmul %0, %1, %cst {dimension_numbers = #tpu.dot_dimension_numbers<[1], [0], [0], [1], [0, 0, 1, 1], [], []>} : vector<8x192xbf16>, vector<192x128xbf16>, vector<8x128xf32> -> vector<8x128xf32>
    %c0_3 = arith.constant 0 : index
    %c0_4 = arith.constant 0 : index
    %3 = vector.load %arg2[%c0_3, %c0_4] : memref<1x128xf32, #tpu.memory_space<vmem>>, vector<1x128xf32>
    %4 = vector.broadcast %3 : vector<1x128xf32> to vector<8x128xf32>
    %5 = arith.addf %2, %4 : vector<8x128xf32>
    %c0_5 = arith.constant 0 : index
    %c0_6 = arith.constant 0 : index
    %6 = vector.load %arg3[%c0_5, %c0_6] : memref<8x128xf32, #tpu.memory_space<vmem>>, vector<8x128xf32>
    tpu.vector_store %arg3[%c0_5, %c0_6], %5 {strides = array<i32>} : memref<8x128xf32, #tpu.memory_space<vmem>>, vector<8x128xf32>,
    return
  }
}

</mosaic_0001>

<bundles_post_ra>
// kernel: tpu_custom_call.1
= control target key start
LH: loop header
LB: loop body
LE: loop exit
PB: predicated region body
PF: predicated region fallthrough
CT: control target
= control target key end

     0   :  { %8 = vsyncpa [#allocation3], 0  ;;  %s353_s0 = inlined_call_operand.hbm [shape: bf16[8,192], index: 0, kind: input, shape index: {}]   ;;  %s354_s1 = inlined_call_operand.hbm [shape: bf16[192,128], index: 1, kind: input, shape index: {}]   ;;  %s355_s2 = inlined_call_operand.vmem [shape: f32[1,128], index: 2, kind: input, shape index: {}]   ;;  %s356_s3 = inlined_call_operand.hbm [shape: f32[8,128], index: 3, kind: output, shape index: {}]  }
   0x1   :  { %9 = vsyncpa [#allocation6], 0 }
   0x2   :  { %10 = vsyncpa [#allocation4], 0  ;;  %s315_s12 = smov [#allocation2]   ;;  %s316_s14 = smov [#allocation5]  }
   0x3   :  { %s17_s13 = sshll.u32 %s315_s12, 4  ;;  %s26_s15 = sshll.u32 %s316_s14, 4  ;;  %s18_s13 = int_to_ptr.vmem [resolvable:$true] %s17_s13  ;;  %s27_s15 = int_to_ptr.vmem [resolvable:$true] %s26_s15 }
   0x4   :  { %s257_s16 = scalar_lea.vmem %s18_s13, 128  ;;  %p262_p1 = scmp.lt.s32.totalorder %s18_s13, %s18_s13 }
   0x5   :  { %p258_p0 = scmp.ne.s32.totalorder %s18_s13, %s257_s16  ;;  %p263_p2 = scmp.lt.s32.totalorder %s257_s16, %s257_s16 }
   0x7   :  { %p264_p3 = por %p263_p2, %p262_p1 }
   0x9   :  { %p265_p4 = pnand %p264_p3, %p258_p0 }
   0xb   :  { %268 = shalt.err (!%p265_p4)
}
   0xc   :  { %20 = dma.hbm_to_vmem [thread:$0]  %s353_s0, 128, %s18_s13, [#allocation3]  }
   0xd   :  { %s277_s19 = scalar_lea.vmem %s27_s15, 1536  ;;  %p282_p6 = scmp.lt.s32.totalorder %s27_s15, %s27_s15 }
   0xe   :  { %p278_p5 = scmp.ne.s32.totalorder %s27_s15, %s277_s19  ;;  %p283_p7 = scmp.lt.s32.totalorder %s277_s19, %s277_s19 }
  0x10   :  { %p284_p8 = por %p283_p7, %p282_p6 }
  0x12   :  { %p285_p9 = pnand %p284_p8, %p278_p5 }
  0x14   :  { %288 = shalt.err (!%p285_p9)
}
  0x15   :  { %s317_s20 = smov 64   ;;  %s318_s21 = smov 4  }
  0x16   :  { %32 = dma.hbm_to_vmem [thread:$0]  %s354_s1, 1536, %s27_s15, [#allocation6], %s317_s20, %s317_s20, %s318_s21  }
  0x17   :  { %309 = dma.done.wait [#allocation3], 128  }
  0x18   :  { %310 = vsyncadd [#allocation3], 4294967168 }
  0x19   :  { %311 = dma.done.wait [#allocation6], 1536  }
  0x1a   :  { %312 = vsyncadd [#allocation6], 4294965760  ;;  %v319_v0 = vmov 0   ;;  %v235_v1 = vld [vmem:[#allocation5 + $0x38] sm:$0xff]   ;;  %v236_v2 = vld [vmem:[#allocation5 + $0x30] sm:$0xff]   ;;  %vm152_vm0 = vcmask 523264  }
  0x1b   :  { %156 = vmatprep.subr.bf16.mxu0 %v319_v0  ;;  %v237_v3 = vld [vmem:[#allocation5 + $0x28] sm:$0xff]   ;;  %v238_v4 = vld [vmem:[#allocation5 + $0x20] sm:$0xff]   ;;  %v42_v5 = vld [vmem:[#allocation2] sm:$0xff]  ;;  %s320_s24 = smov [#allocation7]  }
  0x1c   :  { %157 = vmatpush1.bf16.msra.mxu0 %v235_v1  ;;  %v215_v6 = vcombine.high %v42_v5, %v42_v5  ;;  %v239_v7 = vld [vmem:[#allocation5 + $0x18] sm:$0xff]   ;;  %v240_v8 = vld [vmem:[#allocation5 + $0x10] sm:$0xff]   ;;  %v241_v9 = vld [vmem:[#allocation5 + $0x8] sm:$0xff]   ;;  %v214_v15 = vcombine.low %v42_v5, %v42_v5  ;;  %s203_s25 = sshll.u32 %s320_s24, 4  ;;  %s204_s25 = int_to_ptr.vmem [resolvable:$true] %s203_s25 }
  0x1d   :  { %158 = vmatprep.subr.bf16.mxu0 %v319_v0  ;;  %v242_v10 = vld [vmem:[#allocation5] sm:$0xff]   ;;  %v243_v11 = vld [vmem:[#allocation5 + $0x58] sm:$0xff]   ;;  %v244_v12 = vld [vmem:[#allocation5 + $0x50] sm:$0xff]   ;;  %s289_s26 = scalar_lea.vmem %s204_s25, 128  ;;  %p294_p11 = scmp.lt.s32.totalorder %s204_s25, %s204_s25 }
  0x1e   :  { %228 = vmatprep.mubr.msk.bf16.mxu0 %vm152_vm0, %v215_v6  ;;  %v245_v13 = vld [vmem:[#allocation5 + $0x48] sm:$0xff]   ;;  %v246_v14 = vld [vmem:[#allocation5 + $0x40] sm:$0xff]   ;;  %v213_v16 = vld [vmem:[%s355_s2] ss:$0 sm:$0xff]  ;;  %p290_p10 = scmp.ne.s32.totalorder %s204_s25, %s289_s26  ;;  %p295_p12 = scmp.lt.s32.totalorder %s289_s26, %s289_s26 }
  0x20   :  { %159 = vmatpush1.bf16.msra.mxu0 %v236_v2  ;;  %p296_p13 = por %p295_p12, %p294_p11 }
  0x21   :  { %160 = vmatprep.subr.bf16.mxu0 %v319_v0 }
  0x22   :  { %p297_p0 = pnand %p296_p13, %p290_p10 }
  0x24   :  { %161 = vmatpush1.bf16.msra.mxu0 %v237_v3 }
  0x25   :  { %162 = vmatprep.subr.bf16.mxu0 %v319_v0 }
  0x28   :  { %163 = vmatpush1.bf16.msra.mxu0 %v238_v4 }
  0x29   :  { %164 = vmatprep.subr.bf16.mxu0 %v319_v0 }
  0x2c   :  { %165 = vmatpush1.bf16.msra.mxu0 %v239_v7 }
  0x2d   :  { %166 = vmatprep.subr.bf16.mxu0 %v319_v0 }
  0x30   :  { %167 = vmatpush1.bf16.msra.mxu0 %v240_v8 }
  0x31   :  { %168 = vmatprep.subr.bf16.mxu0 %v319_v0 }
  0x34   :  { %169 = vmatpush1.bf16.msra.mxu0 %v241_v9 }
  0x35   :  { %170 = vmatprep.subr.bf16.mxu0 %v319_v0 }
  0x38   :  { %171 = vmatpush1.bf16.msra.mxu0 %v242_v10 }
  0x39   :  { %180 = vmatprep.subr.bf16.mxu0 %v319_v0 }
  0x3c   :  { %181 = vmatpush2.bf16.msra.mxu0 %v243_v11 }
  0x3d   :  { %182 = vmatprep.subr.bf16.mxu0 %v319_v0 }
  0x40   :  { %183 = vmatpush2.bf16.msra.mxu0 %v244_v12 }
  0x41   :  { %184 = vmatprep.subr.bf16.mxu0 %v319_v0 }
  0x44   :  { %185 = vmatpush2.bf16.msra.mxu0 %v245_v13 }
  0x45   :  { %186 = vmatprep.subr.bf16.mxu0 %v319_v0 }
  0x48   :  { %187 = vmatpush2.bf16.msra.mxu0 %v246_v14 }
  0x4b   :  { %189 = vmatmul.mubr.bf16.vlgmr.msra.gmra.mxu0 %v214_v15 }
 0x10b   :  { %v190_v17 = vpop.f32.mrf.mxu0 }
 0x10c   :  { %v191_v18 = vadd.f32 %v213_v16, %v190_v17 }
 0x10d   :  { %v192_v19 = vpop.f32.mrf.mxu0 }
 0x10e   :  { %196 = vst [vmem:[#allocation7] sm:$0xff] %v191_v18 }
 0x10f   :  { %v193_v20 = vpop.f32.mrf.mxu0 }
 0x110   :  { %300 = shalt.err (!%p297_p0)
}
 0x111   :  { %206 = dma.vmem_to_hbm [thread:$0]  %s204_s25, 128, %s356_s3, [#allocation4]   ;;  %v194_v21 = vpop.f32.mrf.mxu0 }
 0x112   :  { %313 = dma.done.wait [#allocation4], 128  }
 0x113   :  { %314 = vsyncadd [#allocation4], 4294967168 }
 0x114   :  { %210 = vsyncpa [#allocation3], 1 }
 0x115   :  { %211 = vsyncpa [#allocation6], 1 }
 0x116   :  { %212 = vsyncpa [#allocation4], 1 }

</bundles_post_ra>
